<compile_context>
chip_gen: v7x
topology: tpu7x:2x2x1
jax: 0.10.0
libtpu: 0.0.40
codegen_flags: <defaults>
</compile_context>

<pallas_src>
import jax
import jax.numpy as jnp
from jax.experimental import pallas as pl
from jax.experimental.pallas import tpu as pltpu

# ----------------------------- problem sizes --------------------------------
N, C, D, H, W = 2, 16, 4, 4, 16        # x: (N, C, D, H, W); fc acts on W=16
KD = KH = KW = 3
DO, HO, WO = D - KD + 1, H - KH + 1, W - KW + 1   # 2, 2, 14 (valid conv)
CIN = COUT = 16
NPATCH = N * DO * HO                    # 8 output (n, do, ho) slabs
GROUPS = H * N                          # 8 lane-groups for the Linear stage
LANES = NPATCH * W                      # 128 lanes: (do, ho, n, w[0..15])
NW = N * W                              # 32 lanes per h value in y scratch
KDIM = KD * KH * KW * CIN               # 432 = im2col contraction depth
BN_EPS = 1e-5
BN_CNT = float(NPATCH * WO)             # 112 valid elements per channel


# ------------------------------- fused kernel --------------------------------
def fused_kernel(x_ref, fcw_ref, fcb_ref, cw_ref, cb_ref, g_ref, bb_ref,
                 o_ref, y_ref, patch_ref):
    # ---- 1. Linear (lane-dense): (64,128) @ block-diag(8 x fcW^T) (128,128) --
    # x_ref rows = (d, c); lanes = (h, n, w_in).  The block-diagonal weight
    # contracts each 16-lane w group independently -> lanes become (h, n, w_out).
    y = jnp.dot(x_ref[...], fcw_ref[...], preferred_element_type=jnp.float32)
    y = y + fcb_ref[...]                      # bias tiled over the 8 groups
    y_ref[...] = y.reshape(D, CIN, LANES)     # pure sublane regroup, 1 bulk store

    # ---- 2. im2col patches, (432, 128) lane-dense ----------------------------
    # patch row = ((kd*3+kh)*3+kw)*16 + ci ; lanes = (do, ho, n, w) with w padded
    # 14 -> 16 per slab.  Built from 32-aligned 64-lane slices of the scratch +
    # one lane rotation per kw; every store is a dense 16x128 block.
    for kd in range(KD):
        row0 = y_ref[kd]                       # (16, 128), lanes (h, n, w)
        row1 = y_ref[kd + 1]                   # (16, 128)
        for kh in range(KH):
            a = jnp.concatenate(
                [row0[:, kh * NW: kh * NW + 2 * NW],     # do = 0 : h in {kh, kh+1}
                 row1[:, kh * NW: kh * NW + 2 * NW]],    # do = 1
                axis=1)                                  # (16, 128) lanes (do,ho,n,w)
            for kw in range(KW):
                tap = (kd * KH + kh) * KW + kw
                if kw == 0:
                    rolled = a
                else:
                    # shift left by kw within lanes; only the per-slab pad lanes
                    # (w = 14, 15) pick up cross-slab junk and they are masked
                    # out of the BN stats and dropped in the wrapper.
                    rolled = jnp.concatenate([a[:, kw:], a[:, :kw]], axis=1)
                patch_ref[tap * CIN:(tap + 1) * CIN, :] = rolled

    # ---- 3. Conv3d as ONE K=432 matmul ---------------------------------------
    z = jnp.dot(cw_ref[...], patch_ref[...],
                preferred_element_type=jnp.float32)      # (16, 128)
    z = z + cb_ref[...]                                  # (16, 1) conv bias

    # ---- 4. BatchNorm3d (training-mode batch stats), single lane reduction ---
    # TODO(synk): running_mean/running_var momentum tracking is not modelled;
    # forward matches a freshly constructed Model() in PyTorch train() mode.
    lane = jax.lax.broadcasted_iota(jnp.int32, (1, LANES), 1)
    valid = (jnp.bitwise_and(lane, W - 1) < WO).astype(jnp.float32)  # zero pad lanes
    zm = z * valid
    s1 = jnp.sum(zm, axis=1, keepdims=True)              # (16, 1)
    s2 = jnp.sum(zm * zm, axis=1, keepdims=True)         # (16, 1)
    mean = s1 * (1.0 / BN_CNT)
    var = jnp.maximum(s2 * (1.0 / BN_CNT) - mean * mean, 0.0)   # clamp >= 0
    scale = g_ref[...] * jax.lax.rsqrt(var + BN_EPS)
    shift = bb_ref[...] - mean * scale
    o_ref[...] = z * scale + shift                       # (16, 128) dense store


# ------------------------------- wrapper --------------------------------------
def model_forward(x, params):
    """x: (N, C, D, H, W) NCDHW, like the PyTorch module."""
    fc_w, fc_b, conv_w, conv_b, bn_g, bn_b = params

    # Input-side layout plumbing (tiny XLA ops, outside the kernel):
    # NCDHW -> (D, C, H, N, W) -> (D*C, H*N*W) = (64, 128): rows (d, c),
    # lanes (h, n, w) -> everything inside the kernel is 128-lane dense.
    x_lanes = jnp.transpose(x, (2, 1, 3, 0, 4)).reshape(D * CIN, GROUPS * W)

    # Block-diagonal Linear weight: 8 identical fcW^T blocks along the lanes.
    fcw_block = jnp.kron(jnp.eye(GROUPS, dtype=jnp.float32), fc_w.T)   # (128,128)
    fcb_tiled = jnp.tile(fc_b.reshape(1, W), (1, GROUPS))              # (1, 128)

    # Conv weight (Cout, Cin, kd, kh, kw) -> (Cout, kd, kh, kw, Cin) -> (16, 432)
    # column order (kd, kh, kw, ci) matches the in-kernel patch row order.
    conv_w2d = jnp.transpose(conv_w, (0, 2, 3, 4, 1)).reshape(COUT, KDIM)
    conv_b2 = conv_b.reshape(COUT, 1)
    bn_g2 = bn_g.reshape(COUT, 1)
    bn_b2 = bn_b.reshape(COUT, 1)

    z = pl.pallas_call(
        fused_kernel,
        out_shape=jax.ShapeDtypeStruct((COUT, LANES), jnp.float32),
        grid=(1,),
        in_specs=[
            pl.BlockSpec((D * CIN, GROUPS * W), lambda i: (0, 0)),  # x (64,128)
            pl.BlockSpec((GROUPS * W, GROUPS * W), lambda i: (0, 0)),  # fc block-diag
            pl.BlockSpec((1, GROUPS * W), lambda i: (0, 0)),        # fc bias tiled
            pl.BlockSpec((COUT, KDIM), lambda i: (0, 0)),           # conv weight
            pl.BlockSpec((COUT, 1), lambda i: (0, 0)),              # conv bias
            pl.BlockSpec((COUT, 1), lambda i: (0, 0)),              # bn gamma
            pl.BlockSpec((COUT, 1), lambda i: (0, 0)),              # bn beta
        ],
        out_specs=pl.BlockSpec((COUT, LANES), lambda i: (0, 0)),
        scratch_shapes=[
            pltpu.VMEM((D, CIN, LANES), jnp.float32),    # linear output, lane-dense
            pltpu.VMEM((KDIM, LANES), jnp.float32),      # im2col patches (432,128)
        ],
        compiler_params=pltpu.CompilerParams(
            dimension_semantics=("arbitrary",)),
    )(x_lanes, fcw_block, fcb_tiled, conv_w2d, conv_b2, bn_g2, bn_b2)

    # (16, 128) lanes (do, ho, n, w) -> drop the 2 pad lanes per slab and go to
    # PyTorch NCDHW output layout (N, Cout, DO, HO, WO).  Trivial 7 KiB plumbing.
    z5 = z.reshape(COUT, DO, HO, N, W)[..., :WO]          # (16, 2, 2, 2, 14)
    return jnp.transpose(z5, (3, 0, 1, 2, 4))             # (2, 16, 2, 2, 14)


def init_params(key):
    k1, k2, k3, k4 = jax.random.split(key, 4)
    # nn.Linear(16, 16): U(-1/sqrt(fan_in), 1/sqrt(fan_in))
    bnd_fc = 1.0 / jnp.sqrt(16.0)
    fc_w = jax.random.uniform(k1, (16, 16), jnp.float32, -bnd_fc, bnd_fc)  # (out,in)
    fc_b = jax.random.uniform(k2, (16,), jnp.float32, -bnd_fc, bnd_fc)

    # nn.Conv3d(16, 16, 3): fan_in = 16*27
    bnd_cv = 1.0 / jnp.sqrt(16.0 * 27.0)
    conv_w = jax.random.uniform(k3, (COUT, CIN, KD, KH, KW), jnp.float32,
                                -bnd_cv, bnd_cv)
    conv_b = jax.random.uniform(k4, (COUT,), jnp.float32, -bnd_cv, bnd_cv)

    # nn.BatchNorm3d(16) affine defaults
    bn_g = jnp.ones((COUT,), jnp.float32)
    bn_b = jnp.zeros((COUT,), jnp.float32)
    return fc_w, fc_b, conv_w, conv_b, bn_g, bn_b


if __name__ == "__main__":
    key = jax.random.PRNGKey(0)
    kx, kp = jax.random.split(key)
    # (N, C, D, H, W): trailing dim 16 feeds the Linear; conv sees C=16 channels
    x = jax.random.normal(kx, (N, C, D, H, W), jnp.float32)
    params = init_params(kp)

    out = model_forward(x, params)
    jax.block_until_ready(out)
    assert out.shape == (N, COUT, DO, HO, WO)
    print("KERNEL_OK")
</pallas_src>

<mosaic_0001>
module attributes {stable_mosaic.version = 11 : i64} {
  func.func @fused_kernel(%arg0: i32, %arg1: memref<64x128xf32, #tpu.memory_space<vmem>>, %arg2: memref<128x128xf32, #tpu.memory_space<vmem>>, %arg3: memref<1x128xf32, #tpu.memory_space<vmem>>, %arg4: memref<16x432xf32, #tpu.memory_space<vmem>>, %arg5: memref<16x1xf32, #tpu.memory_space<vmem>>, %arg6: memref<16x1xf32, #tpu.memory_space<vmem>>, %arg7: memref<16x1xf32, #tpu.memory_space<vmem>>, %arg8: memref<16x128xf32, #tpu.memory_space<vmem>>, %arg9: memref<4x16x128xf32, #tpu.memory_space<vmem>>, %arg10: memref<432x128xf32, #tpu.memory_space<vmem>>) attributes {dimension_semantics = [#tpu.dimension_semantics<arbitrary>], iteration_bounds = array<i64: 1>, scalar_prefetch = 0 : i64, scratch_operands = 2 : i64, tpu.core_type = #tpu.core_type<tc>, window_params = [{pipeline_mode = #tpu.pipeline_mode<synchronous>, transform_indices = @transform_0, window_bounds = array<i64: 64, 128>}, {pipeline_mode = #tpu.pipeline_mode<synchronous>, transform_indices = @transform_1, window_bounds = array<i64: 128, 128>}, {pipeline_mode = #tpu.pipeline_mode<synchronous>, transform_indices = @transform_2, window_bounds = array<i64: 1, 128>}, {pipeline_mode = #tpu.pipeline_mode<synchronous>, transform_indices = @transform_3, window_bounds = array<i64: 16, 432>}, {pipeline_mode = #tpu.pipeline_mode<synchronous>, transform_indices = @transform_4, window_bounds = array<i64: 16, 1>}, {pipeline_mode = #tpu.pipeline_mode<synchronous>, transform_indices = @transform_5, window_bounds = array<i64: 16, 1>}, {pipeline_mode = #tpu.pipeline_mode<synchronous>, transform_indices = @transform_6, window_bounds = array<i64: 16, 1>}, {pipeline_mode = #tpu.pipeline_mode<synchronous>, transform_indices = @transform_7, window_bounds = array<i64: 16, 128>}]} {
    %c0 = arith.constant 0 : index
    %c0_0 = arith.constant 0 : index
    %0 = vector.load %arg1[%c0, %c0_0] : memref<64x128xf32, #tpu.memory_space<vmem>>, vector<64x128xf32>
    %c0_1 = arith.constant 0 : index
    %c0_2 = arith.constant 0 : index
    %1 = vector.load %arg2[%c0_1, %c0_2] : memref<128x128xf32, #tpu.memory_space<vmem>>, vector<128x128xf32>
    %cst = arith.constant dense<0.000000e+00> : vector<64x128xf32>
    %2 = tpu.matmul %0, %1, %cst {dimension_numbers = #tpu.dot_dimension_numbers<[1], [0], [0], [1], [0, 0, 1, 1], [], []>} : vector<64x128xf32>, vector<128x128xf32>, vector<64x128xf32> -> vector<64x128xf32>
    %c0_3 = arith.constant 0 : index
    %c0_4 = arith.constant 0 : index
    %3 = vector.load %arg3[%c0_3, %c0_4] : memref<1x128xf32, #tpu.memory_space<vmem>>, vector<1x128xf32>
    %4 = vector.broadcast %3 : vector<1x128xf32> to vector<64x128xf32>
    %5 = arith.addf %2, %4 : vector<64x128xf32>
    %6 = vector.shape_cast %5 : vector<64x128xf32> to vector<4x16x128xf32>
    %c0_5 = arith.constant 0 : index
    %c0_6 = arith.constant 0 : index
    %c0_7 = arith.constant 0 : index
    %7 = vector.load %arg9[%c0_5, %c0_6, %c0_7] : memref<4x16x128xf32, #tpu.memory_space<vmem>>, vector<4x16x128xf32>
    tpu.vector_store %arg9[%c0_5, %c0_6, %c0_7], %6 {strides = array<i32>} : memref<4x16x128xf32, #tpu.memory_space<vmem>>, vector<4x16x128xf32>,
    %c0_8 = arith.constant 0 : index
    %c0_9 = arith.constant 0 : index
    %c0_10 = arith.constant 0 : index
    %8 = vector.load %arg9[%c0_8, %c0_9, %c0_10] : memref<4x16x128xf32, #tpu.memory_space<vmem>>, vector<1x16x128xf32>
    %9 = vector.shape_cast %8 : vector<1x16x128xf32> to vector<16x128xf32>
    %c1 = arith.constant 1 : index
    %c0_11 = arith.constant 0 : index
    %c0_12 = arith.constant 0 : index
    %10 = vector.load %arg9[%c1, %c0_11, %c0_12] : memref<4x16x128xf32, #tpu.memory_space<vmem>>, vector<1x16x128xf32>
    %11 = vector.shape_cast %10 : vector<1x16x128xf32> to vector<16x128xf32>
    %12 = vector.extract_strided_slice %9 {offsets = [0, 0], sizes = [16, 64], strides = [1, 1]} : vector<16x128xf32> to vector<16x64xf32>
    %13 = vector.extract_strided_slice %11 {offsets = [0, 0], sizes = [16, 64], strides = [1, 1]} : vector<16x128xf32> to vector<16x64xf32>
    %14 = tpu.concatenate %12, %13 in 1 : vector<16x64xf32>, vector<16x64xf32> -> vector<16x128xf32>
    %c0_13 = arith.constant 0 : index
    %c0_14 = arith.constant 0 : index
    %15 = vector.load %arg10[%c0_13, %c0_14] : memref<432x128xf32, #tpu.memory_space<vmem>>, vector<16x128xf32>
    tpu.vector_store %arg10[%c0_13, %c0_14], %14 {strides = array<i32>} : memref<432x128xf32, #tpu.memory_space<vmem>>, vector<16x128xf32>,
    %16 = vector.extract_strided_slice %14 {offsets = [0, 1], sizes = [16, 127], strides = [1, 1]} : vector<16x128xf32> to vector<16x127xf32>
    %17 = vector.extract_strided_slice %14 {offsets = [0, 0], sizes = [16, 1], strides = [1, 1]} : vector<16x128xf32> to vector<16x1xf32>
    %18 = tpu.concatenate %16, %17 in 1 : vector<16x127xf32>, vector<16x1xf32> -> vector<16x128xf32>
    %c16 = arith.constant 16 : index
    %c0_15 = arith.constant 0 : index
    %19 = vector.load %arg10[%c16, %c0_15] : memref<432x128xf32, #tpu.memory_space<vmem>>, vector<16x128xf32>
    tpu.vector_store %arg10[%c16, %c0_15], %18 {strides = array<i32>} : memref<432x128xf32, #tpu.memory_space<vmem>>, vector<16x128xf32>,
    %20 = vector.extract_strided_slice %14 {offsets = [0, 2], sizes = [16, 126], strides = [1, 1]} : vector<16x128xf32> to vector<16x126xf32>
    %21 = vector.extract_strided_slice %14 {offsets = [0, 0], sizes = [16, 2], strides = [1, 1]} : vector<16x128xf32> to vector<16x2xf32>
    %22 = tpu.concatenate %20, %21 in 1 : vector<16x126xf32>, vector<16x2xf32> -> vector<16x128xf32>
    %c32 = arith.constant 32 : index
    %c0_16 = arith.constant 0 : index
    %23 = vector.load %arg10[%c32, %c0_16] : memref<432x128xf32, #tpu.memory_space<vmem>>, vector<16x128xf32>
    tpu.vector_store %arg10[%c32, %c0_16], %22 {strides = array<i32>} : memref<432x128xf32, #tpu.memory_space<vmem>>, vector<16x128xf32>,
    %24 = vector.extract_strided_slice %9 {offsets = [0, 32], sizes = [16, 64], strides = [1, 1]} : vector<16x128xf32> to vector<16x64xf32>
    %25 = vector.extract_strided_slice %11 {offsets = [0, 32], sizes = [16, 64], strides = [1, 1]} : vector<16x128xf32> to vector<16x64xf32>
    %26 = tpu.concatenate %24, %25 in 1 : vector<16x64xf32>, vector<16x64xf32> -> vector<16x128xf32>
    %c48 = arith.constant 48 : index
    %c0_17 = arith.constant 0 : index
    %27 = vector.load %arg10[%c48, %c0_17] : memref<432x128xf32, #tpu.memory_space<vmem>>, vector<16x128xf32>
    tpu.vector_store %arg10[%c48, %c0_17], %26 {strides = array<i32>} : memref<432x128xf32, #tpu.memory_space<vmem>>, vector<16x128xf32>,
    %28 = vector.extract_strided_slice %26 {offsets = [0, 1], sizes = [16, 127], strides = [1, 1]} : vector<16x128xf32> to vector<16x127xf32>
    %29 = vector.extract_strided_slice %26 {offsets = [0, 0], sizes = [16, 1], strides = [1, 1]} : vector<16x128xf32> to vector<16x1xf32>
    %30 = tpu.concatenate %28, %29 in 1 : vector<16x127xf32>, vector<16x1xf32> -> vector<16x128xf32>
    %c64 = arith.constant 64 : index
    %c0_18 = arith.constant 0 : index
    %31 = vector.load %arg10[%c64, %c0_18] : memref<432x128xf32, #tpu.memory_space<vmem>>, vector<16x128xf32>
    tpu.vector_store %arg10[%c64, %c0_18], %30 {strides = array<i32>} : memref<432x128xf32, #tpu.memory_space<vmem>>, vector<16x128xf32>,
    %32 = vector.extract_strided_slice %26 {offsets = [0, 2], sizes = [16, 126], strides = [1, 1]} : vector<16x128xf32> to vector<16x126xf32>
    %33 = vector.extract_strided_slice %26 {offsets = [0, 0], sizes = [16, 2], strides = [1, 1]} : vector<16x128xf32> to vector<16x2xf32>
    %34 = tpu.concatenate %32, %33 in 1 : vector<16x126xf32>, vector<16x2xf32> -> vector<16x128xf32>
    %c80 = arith.constant 80 : index
    %c0_19 = arith.constant 0 : index
    %35 = vector.load %arg10[%c80, %c0_19] : memref<432x128xf32, #tpu.memory_space<vmem>>, vector<16x128xf32>
    tpu.vector_store %arg10[%c80, %c0_19], %34 {strides = array<i32>} : memref<432x128xf32, #tpu.memory_space<vmem>>, vector<16x128xf32>,
    %36 = vector.extract_strided_slice %9 {offsets = [0, 64], sizes = [16, 64], strides = [1, 1]} : vector<16x128xf32> to vector<16x64xf32>
    %37 = vector.extract_strided_slice %11 {offsets = [0, 64], sizes = [16, 64], strides = [1, 1]} : vector<16x128xf32> to vector<16x64xf32>
    %38 = tpu.concatenate %36, %37 in 1 : vector<16x64xf32>, vector<16x64xf32> -> vector<16x128xf32>
    %c96 = arith.constant 96 : index
    %c0_20 = arith.constant 0 : index
    %39 = vector.load %arg10[%c96, %c0_20] : memref<432x128xf32, #tpu.memory_space<vmem>>, vector<16x128xf32>
    tpu.vector_store %arg10[%c96, %c0_20], %38 {strides = array<i32>} : memref<432x128xf32, #tpu.memory_space<vmem>>, vector<16x128xf32>,
    %40 = vector.extract_strided_slice %38 {offsets = [0, 1], sizes = [16, 127], strides = [1, 1]} : vector<16x128xf32> to vector<16x127xf32>
    %41 = vector.extract_strided_slice %38 {offsets = [0, 0], sizes = [16, 1], strides = [1, 1]} : vector<16x128xf32> to vector<16x1xf32>
    %42 = tpu.concatenate %40, %41 in 1 : vector<16x127xf32>, vector<16x1xf32> -> vector<16x128xf32>
    %c112 = arith.constant 112 : index
    %c0_21 = arith.constant 0 : index
    %43 = vector.load %arg10[%c112, %c0_21] : memref<432x128xf32, #tpu.memory_space<vmem>>, vector<16x128xf32>
    tpu.vector_store %arg10[%c112, %c0_21], %42 {strides = array<i32>} : memref<432x128xf32, #tpu.memory_space<vmem>>, vector<16x128xf32>,
    %44 = vector.extract_strided_slice %38 {offsets = [0, 2], sizes = [16, 126], strides = [1, 1]} : vector<16x128xf32> to vector<16x126xf32>
    %45 = vector.extract_strided_slice %38 {offsets = [0, 0], sizes = [16, 2], strides = [1, 1]} : vector<16x128xf32> to vector<16x2xf32>
    %46 = tpu.concatenate %44, %45 in 1 : vector<16x126xf32>, vector<16x2xf32> -> vector<16x128xf32>
    %c128 = arith.constant 128 : index
    %c0_22 = arith.constant 0 : index
    %47 = vector.load %arg10[%c128, %c0_22] : memref<432x128xf32, #tpu.memory_space<vmem>>, vector<16x128xf32>
    tpu.vector_store %arg10[%c128, %c0_22], %46 {strides = array<i32>} : memref<432x128xf32, #tpu.memory_space<vmem>>, vector<16x128xf32>,
    %c1_23 = arith.constant 1 : index
    %c0_24 = arith.constant 0 : index
    %c0_25 = arith.constant 0 : index
    %48 = vector.load %arg9[%c1_23, %c0_24, %c0_25] : memref<4x16x128xf32, #tpu.memory_space<vmem>>, vector<1x16x128xf32>
    %49 = vector.shape_cast %48 : vector<1x16x128xf32> to vector<16x128xf32>
    %c2 = arith.constant 2 : index
    %c0_26 = arith.constant 0 : index
    %c0_27 = arith.constant 0 : index
    %50 = vector.load %arg9[%c2, %c0_26, %c0_27] : memref<4x16x128xf32, #tpu.memory_space<vmem>>, vector<1x16x128xf32>
    %51 = vector.shape_cast %50 : vector<1x16x128xf32> to vector<16x128xf32>
    %52 = vector.extract_strided_slice %49 {offsets = [0, 0], sizes = [16, 64], strides = [1, 1]} : vector<16x128xf32> to vector<16x64xf32>
    %53 = vector.extract_strided_slice %51 {offsets = [0, 0], sizes = [16, 64], strides = [1, 1]} : vector<16x128xf32> to vector<16x64xf32>
    %54 = tpu.concatenate %52, %53 in 1 : vector<16x64xf32>, vector<16x64xf32> -> vector<16x128xf32>
    %c144 = arith.constant 144 : index
    %c0_28 = arith.constant 0 : index
    %55 = vector.load %arg10[%c144, %c0_28] : memref<432x128xf32, #tpu.memory_space<vmem>>, vector<16x128xf32>
    tpu.vector_store %arg10[%c144, %c0_28], %54 {strides = array<i32>} : memref<432x128xf32, #tpu.memory_space<vmem>>, vector<16x128xf32>,
    %56 = vector.extract_strided_slice %54 {offsets = [0, 1], sizes = [16, 127], strides = [1, 1]} : vector<16x128xf32> to vector<16x127xf32>
    %57 = vector.extract_strided_slice %54 {offsets = [0, 0], sizes = [16, 1], strides = [1, 1]} : vector<16x128xf32> to vector<16x1xf32>
    %58 = tpu.concatenate %56, %57 in 1 : vector<16x127xf32>, vector<16x1xf32> -> vector<16x128xf32>
    %c160 = arith.constant 160 : index
    %c0_29 = arith.constant 0 : index
    %59 = vector.load %arg10[%c160, %c0_29] : memref<432x128xf32, #tpu.memory_space<vmem>>, vector<16x128xf32>
    tpu.vector_store %arg10[%c160, %c0_29], %58 {strides = array<i32>} : memref<432x128xf32, #tpu.memory_space<vmem>>, vector<16x128xf32>,
    %60 = vector.extract_strided_slice %54 {offsets = [0, 2], sizes = [16, 126], strides = [1, 1]} : vector<16x128xf32> to vector<16x126xf32>
    %61 = vector.extract_strided_slice %54 {offsets = [0, 0], sizes = [16, 2], strides = [1, 1]} : vector<16x128xf32> to vector<16x2xf32>
    %62 = tpu.concatenate %60, %61 in 1 : vector<16x126xf32>, vector<16x2xf32> -> vector<16x128xf32>
    %c176 = arith.constant 176 : index
    %c0_30 = arith.constant 0 : index
    %63 = vector.load %arg10[%c176, %c0_30] : memref<432x128xf32, #tpu.memory_space<vmem>>, vector<16x128xf32>
    tpu.vector_store %arg10[%c176, %c0_30], %62 {strides = array<i32>} : memref<432x128xf32, #tpu.memory_space<vmem>>, vector<16x128xf32>,
    %64 = vector.extract_strided_slice %49 {offsets = [0, 32], sizes = [16, 64], strides = [1, 1]} : vector<16x128xf32> to vector<16x64xf32>
    %65 = vector.extract_strided_slice %51 {offsets = [0, 32], sizes = [16, 64], strides = [1, 1]} : vector<16x128xf32> to vector<16x64xf32>
    %66 = tpu.concatenate %64, %65 in 1 : vector<16x64xf32>, vector<16x64xf32> -> vector<16x128xf32>
    %c192 = arith.constant 192 : index
    %c0_31 = arith.constant 0 : index
    %67 = vector.load %arg10[%c192, %c0_31] : memref<432x128xf32, #tpu.memory_space<vmem>>, vector<16x128xf32>
    tpu.vector_store %arg10[%c192, %c0_31], %66 {strides = array<i32>} : memref<432x128xf32, #tpu.memory_space<vmem>>, vector<16x128xf32>,
    %68 = vector.extract_strided_slice %66 {offsets = [0, 1], sizes = [16, 127], strides = [1, 1]} : vector<16x128xf32> to vector<16x127xf32>
    %69 = vector.extract_strided_slice %66 {offsets = [0, 0], sizes = [16, 1], strides = [1, 1]} : vector<16x128xf32> to vector<16x1xf32>
    %70 = tpu.concatenate %68, %69 in 1 : vector<16x127xf32>, vector<16x1xf32> -> vector<16x128xf32>
    %c208 = arith.constant 208 : index
    %c0_32 = arith.constant 0 : index
    %71 = vector.load %arg10[%c208, %c0_32] : memref<432x128xf32, #tpu.memory_space<vmem>>, vector<16x128xf32>
    tpu.vector_store %arg10[%c208, %c0_32], %70 {strides = array<i32>} : memref<432x128xf32, #tpu.memory_space<vmem>>, vector<16x128xf32>,
    %72 = vector.extract_strided_slice %66 {offsets = [0, 2], sizes = [16, 126], strides = [1, 1]} : vector<16x128xf32> to vector<16x126xf32>
    %73 = vector.extract_strided_slice %66 {offsets = [0, 0], sizes = [16, 2], strides = [1, 1]} : vector<16x128xf32> to vector<16x2xf32>
    %74 = tpu.concatenate %72, %73 in 1 : vector<16x126xf32>, vector<16x2xf32> -> vector<16x128xf32>
    %c224 = arith.constant 224 : index
    %c0_33 = arith.constant 0 : index
    %75 = vector.load %arg10[%c224, %c0_33] : memref<432x128xf32, #tpu.memory_space<vmem>>, vector<16x128xf32>
    tpu.vector_store %arg10[%c224, %c0_33], %74 {strides = array<i32>} : memref<432x128xf32, #tpu.memory_space<vmem>>, vector<16x128xf32>,
    %76 = vector.extract_strided_slice %49 {offsets = [0, 64], sizes = [16, 64], strides = [1, 1]} : vector<16x128xf32> to vector<16x64xf32>
    %77 = vector.extract_strided_slice %51 {offsets = [0, 64], sizes = [16, 64], strides = [1, 1]} : vector<16x128xf32> to vector<16x64xf32>
    %78 = tpu.concatenate %76, %77 in 1 : vector<16x64xf32>, vector<16x64xf32> -> vector<16x128xf32>
    %c240 = arith.constant 240 : index
    %c0_34 = arith.constant 0 : index
    %79 = vector.load %arg10[%c240, %c0_34] : memref<432x128xf32, #tpu.memory_space<vmem>>, vector<16x128xf32>
    tpu.vector_store %arg10[%c240, %c0_34], %78 {strides = array<i32>} : memref<432x128xf32, #tpu.memory_space<vmem>>, vector<16x128xf32>,
    %80 = vector.extract_strided_slice %78 {offsets = [0, 1], sizes = [16, 127], strides = [1, 1]} : vector<16x128xf32> to vector<16x127xf32>
    %81 = vector.extract_strided_slice %78 {offsets = [0, 0], sizes = [16, 1], strides = [1, 1]} : vector<16x128xf32> to vector<16x1xf32>
    %82 = tpu.concatenate %80, %81 in 1 : vector<16x127xf32>, vector<16x1xf32> -> vector<16x128xf32>
    %c256 = arith.constant 256 : index
    %c0_35 = arith.constant 0 : index
    %83 = vector.load %arg10[%c256, %c0_35] : memref<432x128xf32, #tpu.memory_space<vmem>>, vector<16x128xf32>
    tpu.vector_store %arg10[%c256, %c0_35], %82 {strides = array<i32>} : memref<432x128xf32, #tpu.memory_space<vmem>>, vector<16x128xf32>,
    %84 = vector.extract_strided_slice %78 {offsets = [0, 2], sizes = [16, 126], strides = [1, 1]} : vector<16x128xf32> to vector<16x126xf32>
    %85 = vector.extract_strided_slice %78 {offsets = [0, 0], sizes = [16, 2], strides = [1, 1]} : vector<16x128xf32> to vector<16x2xf32>
    %86 = tpu.concatenate %84, %85 in 1 : vector<16x126xf32>, vector<16x2xf32> -> vector<16x128xf32>
    %c272 = arith.constant 272 : index
    %c0_36 = arith.constant 0 : index
    %87 = vector.load %arg10[%c272, %c0_36] : memref<432x128xf32, #tpu.memory_space<vmem>>, vector<16x128xf32>
    tpu.vector_store %arg10[%c272, %c0_36], %86 {strides = array<i32>} : memref<432x128xf32, #tpu.memory_space<vmem>>, vector<16x128xf32>,
    %c2_37 = arith.constant 2 : index
    %c0_38 = arith.constant 0 : index
    %c0_39 = arith.constant 0 : index
    %88 = vector.load %arg9[%c2_37, %c0_38, %c0_39] : memref<4x16x128xf32, #tpu.memory_space<vmem>>, vector<1x16x128xf32>
    %89 = vector.shape_cast %88 : vector<1x16x128xf32> to vector<16x128xf32>
    %c3 = arith.constant 3 : index
    %c0_40 = arith.constant 0 : index
    %c0_41 = arith.constant 0 : index
    %90 = vector.load %arg9[%c3, %c0_40, %c0_41] : memref<4x16x128xf32, #tpu.memory_space<vmem>>, vector<1x16x128xf32>
    %91 = vector.shape_cast %90 : vector<1x16x128xf32> to vector<16x128xf32>
    %92 = vector.extract_strided_slice %89 {offsets = [0, 0], sizes = [16, 64], strides = [1, 1]} : vector<16x128xf32> to vector<16x64xf32>
    %93 = vector.extract_strided_slice %91 {offsets = [0, 0], sizes = [16, 64], strides = [1, 1]} : vector<16x128xf32> to vector<16x64xf32>
    %94 = tpu.concatenate %92, %93 in 1 : vector<16x64xf32>, vector<16x64xf32> -> vector<16x128xf32>
    %c288 = arith.constant 288 : index
    %c0_42 = arith.constant 0 : index
    %95 = vector.load %arg10[%c288, %c0_42] : memref<432x128xf32, #tpu.memory_space<vmem>>, vector<16x128xf32>
    tpu.vector_store %arg10[%c288, %c0_42], %94 {strides = array<i32>} : memref<432x128xf32, #tpu.memory_space<vmem>>, vector<16x128xf32>,
    %96 = vector.extract_strided_slice %94 {offsets = [0, 1], sizes = [16, 127], strides = [1, 1]} : vector<16x128xf32> to vector<16x127xf32>
    %97 = vector.extract_strided_slice %94 {offsets = [0, 0], sizes = [16, 1], strides = [1, 1]} : vector<16x128xf32> to vector<16x1xf32>
    %98 = tpu.concatenate %96, %97 in 1 : vector<16x127xf32>, vector<16x1xf32> -> vector<16x128xf32>
    %c304 = arith.constant 304 : index
    %c0_43 = arith.constant 0 : index
    %99 = vector.load %arg10[%c304, %c0_43] : memref<432x128xf32, #tpu.memory_space<vmem>>, vector<16x128xf32>
    tpu.vector_store %arg10[%c304, %c0_43], %98 {strides = array<i32>} : memref<432x128xf32, #tpu.memory_space<vmem>>, vector<16x128xf32>,
    %100 = vector.extract_strided_slice %94 {offsets = [0, 2], sizes = [16, 126], strides = [1, 1]} : vector<16x128xf32> to vector<16x126xf32>
    %101 = vector.extract_strided_slice %94 {offsets = [0, 0], sizes = [16, 2], strides = [1, 1]} : vector<16x128xf32> to vector<16x2xf32>
    %102 = tpu.concatenate %100, %101 in 1 : vector<16x126xf32>, vector<16x2xf32> -> vector<16x128xf32>
    %c320 = arith.constant 320 : index
    %c0_44 = arith.constant 0 : index
    %103 = vector.load %arg10[%c320, %c0_44] : memref<432x128xf32, #tpu.memory_space<vmem>>, vector<16x128xf32>
    tpu.vector_store %arg10[%c320, %c0_44], %102 {strides = array<i32>} : memref<432x128xf32, #tpu.memory_space<vmem>>, vector<16x128xf32>,
    %104 = vector.extract_strided_slice %89 {offsets = [0, 32], sizes = [16, 64], strides = [1, 1]} : vector<16x128xf32> to vector<16x64xf32>
    %105 = vector.extract_strided_slice %91 {offsets = [0, 32], sizes = [16, 64], strides = [1, 1]} : vector<16x128xf32> to vector<16x64xf32>
    %106 = tpu.concatenate %104, %105 in 1 : vector<16x64xf32>, vector<16x64xf32> -> vector<16x128xf32>
    %c336 = arith.constant 336 : index
    %c0_45 = arith.constant 0 : index
    %107 = vector.load %arg10[%c336, %c0_45] : memref<432x128xf32, #tpu.memory_space<vmem>>, vector<16x128xf32>
    tpu.vector_store %arg10[%c336, %c0_45], %106 {strides = array<i32>} : memref<432x128xf32, #tpu.memory_space<vmem>>, vector<16x128xf32>,
    %108 = vector.extract_strided_slice %106 {offsets = [0, 1], sizes = [16, 127], strides = [1, 1]} : vector<16x128xf32> to vector<16x127xf32>
    %109 = vector.extract_strided_slice %106 {offsets = [0, 0], sizes = [16, 1], strides = [1, 1]} : vector<16x128xf32> to vector<16x1xf32>
    %110 = tpu.concatenate %108, %109 in 1 : vector<16x127xf32>, vector<16x1xf32> -> vector<16x128xf32>
    %c352 = arith.constant 352 : index
    %c0_46 = arith.constant 0 : index
    %111 = vector.load %arg10[%c352, %c0_46] : memref<432x128xf32, #tpu.memory_space<vmem>>, vector<16x128xf32>
    tpu.vector_store %arg10[%c352, %c0_46], %110 {strides = array<i32>} : memref<432x128xf32, #tpu.memory_space<vmem>>, vector<16x128xf32>,
    %112 = vector.extract_strided_slice %106 {offsets = [0, 2], sizes = [16, 126], strides = [1, 1]} : vector<16x128xf32> to vector<16x126xf32>
    %113 = vector.extract_strided_slice %106 {offsets = [0, 0], sizes = [16, 2], strides = [1, 1]} : vector<16x128xf32> to vector<16x2xf32>
    %114 = tpu.concatenate %112, %113 in 1 : vector<16x126xf32>, vector<16x2xf32> -> vector<16x128xf32>
    %c368 = arith.constant 368 : index
    %c0_47 = arith.constant 0 : index
    %115 = vector.load %arg10[%c368, %c0_47] : memref<432x128xf32, #tpu.memory_space<vmem>>, vector<16x128xf32>
    tpu.vector_store %arg10[%c368, %c0_47], %114 {strides = array<i32>} : memref<432x128xf32, #tpu.memory_space<vmem>>, vector<16x128xf32>,
    %116 = vector.extract_strided_slice %89 {offsets = [0, 64], sizes = [16, 64], strides = [1, 1]} : vector<16x128xf32> to vector<16x64xf32>
    %117 = vector.extract_strided_slice %91 {offsets = [0, 64], sizes = [16, 64], strides = [1, 1]} : vector<16x128xf32> to vector<16x64xf32>
    %118 = tpu.concatenate %116, %117 in 1 : vector<16x64xf32>, vector<16x64xf32> -> vector<16x128xf32>
    %c384 = arith.constant 384 : index
    %c0_48 = arith.constant 0 : index
    %119 = vector.load %arg10[%c384, %c0_48] : memref<432x128xf32, #tpu.memory_space<vmem>>, vector<16x128xf32>
    tpu.vector_store %arg10[%c384, %c0_48], %118 {strides = array<i32>} : memref<432x128xf32, #tpu.memory_space<vmem>>, vector<16x128xf32>,
    %120 = vector.extract_strided_slice %118 {offsets = [0, 1], sizes = [16, 127], strides = [1, 1]} : vector<16x128xf32> to vector<16x127xf32>
    %121 = vector.extract_strided_slice %118 {offsets = [0, 0], sizes = [16, 1], strides = [1, 1]} : vector<16x128xf32> to vector<16x1xf32>
    %122 = tpu.concatenate %120, %121 in 1 : vector<16x127xf32>, vector<16x1xf32> -> vector<16x128xf32>
    %c400 = arith.constant 400 : index
    %c0_49 = arith.constant 0 : index
    %123 = vector.load %arg10[%c400, %c0_49] : memref<432x128xf32, #tpu.memory_space<vmem>>, vector<16x128xf32>
    tpu.vector_store %arg10[%c400, %c0_49], %122 {strides = array<i32>} : memref<432x128xf32, #tpu.memory_space<vmem>>, vector<16x128xf32>,
    %124 = vector.extract_strided_slice %118 {offsets = [0, 2], sizes = [16, 126], strides = [1, 1]} : vector<16x128xf32> to vector<16x126xf32>
    %125 = vector.extract_strided_slice %118 {offsets = [0, 0], sizes = [16, 2], strides = [1, 1]} : vector<16x128xf32> to vector<16x2xf32>
    %126 = tpu.concatenate %124, %125 in 1 : vector<16x126xf32>, vector<16x2xf32> -> vector<16x128xf32>
    %c416 = arith.constant 416 : index
    %c0_50 = arith.constant 0 : index
    %127 = vector.load %arg10[%c416, %c0_50] : memref<432x128xf32, #tpu.memory_space<vmem>>, vector<16x128xf32>
    tpu.vector_store %arg10[%c416, %c0_50], %126 {strides = array<i32>} : memref<432x128xf32, #tpu.memory_space<vmem>>, vector<16x128xf32>,
    %c0_51 = arith.constant 0 : index
    %c0_52 = arith.constant 0 : index
    %128 = vector.load %arg4[%c0_51, %c0_52] : memref<16x432xf32, #tpu.memory_space<vmem>>, vector<16x432xf32>
    %c0_53 = arith.constant 0 : index
    %c0_54 = arith.constant 0 : index
    %129 = vector.load %arg10[%c0_53, %c0_54] : memref<432x128xf32, #tpu.memory_space<vmem>>, vector<432x128xf32>
    %cst_55 = arith.constant dense<0.000000e+00> : vector<16x128xf32>
    %130 = tpu.matmul %128, %129, %cst_55 {dimension_numbers = #tpu.dot_dimension_numbers<[1], [0], [0], [1], [0, 0, 1, 1], [], []>} : vector<16x432xf32>, vector<432x128xf32>, vector<16x128xf32> -> vector<16x128xf32>
    %c0_56 = arith.constant 0 : index
    %c0_57 = arith.constant 0 : index
    %131 = vector.load %arg5[%c0_56, %c0_57] : memref<16x1xf32, #tpu.memory_space<vmem>>, vector<16x1xf32>
    %132 = vector.broadcast %131 : vector<16x1xf32> to vector<16x128xf32>
    %133 = arith.addf %130, %132 : vector<16x128xf32>
    %134 = tpu.iota {dimensions = array<i32: 1>} : vector<1x128xi32>
    %c15_i32 = arith.constant 15 : i32
    %135 = vector.broadcast %c15_i32 : i32 to vector<1x128xi32>
    %136 = arith.andi %134, %135 : vector<1x128xi32>
    %c14_i32 = arith.constant 14 : i32
    %137 = vector.broadcast %c14_i32 : i32 to vector<1x128xi32>
    %138 = arith.cmpi slt, %136, %137 : vector<1x128xi32>
    %139 = arith.extui %138 : vector<1x128xi1> to vector<1x128xi32>
    %140 = arith.sitofp %139 : vector<1x128xi32> to vector<1x128xf32>
    %141 = vector.broadcast %140 : vector<1x128xf32> to vector<16x128xf32>
    %142 = arith.mulf %133, %141 : vector<16x128xf32>
    %cst_58 = arith.constant dense<0.000000e+00> : vector<16xf32>
    %143 = vector.multi_reduction <add>, %142, %cst_58 [1] : vector<16x128xf32> to vector<16xf32>
    %144 = vector.shape_cast %143 : vector<16xf32> to vector<16x1xf32>
    %145 = arith.mulf %142, %142 : vector<16x128xf32>
    %cst_59 = arith.constant dense<0.000000e+00> : vector<16xf32>
    %146 = vector.multi_reduction <add>, %145, %cst_59 [1] : vector<16x128xf32> to vector<16xf32>
    %147 = vector.shape_cast %146 : vector<16xf32> to vector<16x1xf32>
    %cst_60 = arith.constant 0.00892857183 : f32
    %148 = vector.broadcast %cst_60 : f32 to vector<16x1xf32>
    %149 = arith.mulf %144, %148 : vector<16x1xf32>
    %cst_61 = arith.constant 0.00892857183 : f32
    %150 = vector.broadcast %cst_61 : f32 to vector<16x1xf32>
    %151 = arith.mulf %147, %150 : vector<16x1xf32>
    %152 = arith.mulf %149, %149 : vector<16x1xf32>
    %153 = arith.subf %151, %152 : vector<16x1xf32>
    %cst_62 = arith.constant 0.000000e+00 : f32
    %154 = vector.broadcast %cst_62 : f32 to vector<16x1xf32>
    %155 = arith.maximumf %153, %154 : vector<16x1xf32>
    %c0_63 = arith.constant 0 : index
    %c0_64 = arith.constant 0 : index
    %156 = vector.load %arg6[%c0_63, %c0_64] : memref<16x1xf32, #tpu.memory_space<vmem>>, vector<16x1xf32>
    %cst_65 = arith.constant 9.99999974E-6 : f32
    %157 = vector.broadcast %cst_65 : f32 to vector<16x1xf32>
    %158 = arith.addf %155, %157 : vector<16x1xf32>
    %159 = math.rsqrt %158 : vector<16x1xf32>
    %160 = arith.mulf %156, %159 : vector<16x1xf32>
    %c0_66 = arith.constant 0 : index
    %c0_67 = arith.constant 0 : index
    %161 = vector.load %arg7[%c0_66, %c0_67] : memref<16x1xf32, #tpu.memory_space<vmem>>, vector<16x1xf32>
    %162 = arith.mulf %149, %160 : vector<16x1xf32>
    %163 = arith.subf %161, %162 : vector<16x1xf32>
    %164 = vector.broadcast %160 : vector<16x1xf32> to vector<16x128xf32>
    %165 = arith.mulf %133, %164 : vector<16x128xf32>
    %166 = vector.broadcast %163 : vector<16x1xf32> to vector<16x128xf32>
    %167 = arith.addf %165, %166 : vector<16x128xf32>
    %c0_68 = arith.constant 0 : index
    %c0_69 = arith.constant 0 : index
    %168 = vector.load %arg8[%c0_68, %c0_69] : memref<16x128xf32, #tpu.memory_space<vmem>>, vector<16x128xf32>
    tpu.vector_store %arg8[%c0_68, %c0_69], %167 {strides = array<i32>} : memref<16x128xf32, #tpu.memory_space<vmem>>, vector<16x128xf32>,
    return
  }
  func.func @transform_0(%arg0: i32) -> (i32, i32) {
    %c0_i32 = arith.constant 0 : i32
    %c0_i32_0 = arith.constant 0 : i32
    %c0_i32_1 = arith.constant 0 : i32
    return %c0_i32, %c0_i32_0 : i32, i32
  }
  func.func @transform_1(%arg0: i32) -> (i32, i32) {
    %c0_i32 = arith.constant 0 : i32
    %c0_i32_0 = arith.constant 0 : i32
    %c0_i32_1 = arith.constant 0 : i32
    return %c0_i32, %c0_i32_0 : i32, i32
  }
  func.func @transform_2(%arg0: i32) -> (i32, i32) {
    %c0_i32 = arith.constant 0 : i32
    %c0_i32_0 = arith.constant 0 : i32
    %c0_i32_1 = arith.constant 0 : i32
    return %c0_i32, %c0_i32_0 : i32, i32
  }
  func.func @transform_3(%arg0: i32) -> (i32, i32) {
    %c0_i32 = arith.constant 0 : i32
    %c0_i32_0 = arith.constant 0 : i32
    %c0_i32_1 = arith.constant 0 : i32
    return %c0_i32, %c0_i32_0 : i32, i32
  }
  func.func @transform_4(%arg0: i32) -> (i32, i32) {
    %c0_i32 = arith.constant 0 : i32
    %c0_i32_0 = arith.constant 0 : i32
    %c0_i32_1 = arith.constant 0 : i32
    return %c0_i32, %c0_i32_0 : i32, i32
  }
  func.func @transform_5(%arg0: i32) -> (i32, i32) {
    %c0_i32 = arith.constant 0 : i32
    %c0_i32_0 = arith.constant 0 : i32
    %c0_i32_1 = arith.constant 0 : i32
    return %c0_i32, %c0_i32_0 : i32, i32
  }
  func.func @transform_6(%arg0: i32) -> (i32, i32) {
    %c0_i32 = arith.constant 0 : i32
    %c0_i32_0 = arith.constant 0 : i32
    %c0_i32_1 = arith.constant 0 : i32
    return %c0_i32, %c0_i32_0 : i32, i32
  }
  func.func @transform_7(%arg0: i32) -> (i32, i32) {
    %c0_i32 = arith.constant 0 : i32
    %c0_i32_0 = arith.constant 0 : i32
    %c0_i32_1 = arith.constant 0 : i32
    return %c0_i32, %c0_i32_0 : i32, i32
  }
}

</mosaic_0001>

<bundles_post_ra>
// kernel: tpu_custom_call.1
= control target key start
LH: loop header
LB: loop body
LE: loop exit
PB: predicated region body
PF: predicated region fallthrough
CT: control target
= control target key end

     0   :  { %12 = vsyncpa [#allocation5], 0  ;;  %s1613_s0 = inlined_call_operand.hbm [shape: f32[64,128], index: 0, kind: input, shape index: {}]   ;;  %s1614_s1 = inlined_call_operand.hbm [shape: f32[128,128], index: 1, kind: input, shape index: {}]   ;;  %s1615_s2 = inlined_call_operand.vmem [shape: f32[1,128], index: 2, kind: input, shape index: {}]   ;;  %s1616_s3 = inlined_call_operand.hbm [shape: f32[16,432], index: 3, kind: input, shape index: {}]   ;;  %s1617_s4 = inlined_call_operand.vmem [shape: f32[16,1], index: 4, kind: input, shape index: {}]   ;;  %s1618_s5 = inlined_call_operand.vmem [shape: f32[16,1], index: 5, kind: input, shape index: {}]   ;;  %s1619_s6 = inlined_call_operand.vmem [shape: f32[16,1], index: 6, kind: input, shape index: {}]   ;;  %s1620_s7 = inlined_call_operand.hbm [shape: f32[16,128], index: 7, kind: output, shape index: {}]  }
   0x1   :  { %13 = vsyncpa [#allocation8], 0 }
   0x2   :  { %14 = vsyncpa [#allocation6], 0  ;;  %s1299_s24 = smov [#allocation7]   ;;  %s1300_s26 = smov [#allocation4]  }
   0x3   :  { %s32_s25 = sshll.u32 %s1299_s24, 4  ;;  %s20_s27 = sshll.u32 %s1300_s26, 4  ;;  %s33_s25 = int_to_ptr.vmem [resolvable:$true] %s32_s25  ;;  %s1354_s27 = int_to_ptr.vmem [resolvable:$true] %s20_s27 }
   0x4   :  { %s1205_s30 = scalar_lea.hbm %s1614_s1, 2048 }
   0x5   :  { %p1206_p0 = scmp.ne.s32.totalorder %s1614_s1, %s1205_s30  ;;  %p1209_p1 = scmp.lt.u32.totalorder %s1205_s30, %s1614_s1 }
   0x7   :  { %p1211_p2 = pnand %p1209_p1, %p1206_p0 }
   0x9   :  { %1214 = shalt.err (!%p1211_p2)
}
   0xa   :  { %s1215_s12 = scalar_lea.vmem %s33_s25, 2048  ;;  %p1220_p4 = scmp.lt.s32.totalorder %s33_s25, %s33_s25 }
   0xb   :  { %p1216_p3 = scmp.ne.s32.totalorder %s33_s25, %s1215_s12  ;;  %p1221_p5 = scmp.lt.s32.totalorder %s1215_s12, %s1215_s12 }
   0xd   :  { %p1222_p6 = por %p1221_p5, %p1220_p4 }
   0xf   :  { %p1223_p7 = pnand %p1222_p6, %p1216_p3 }
  0x11   :  { %1226 = shalt.err (!%p1223_p7)
}
  0x12   :  { %s1301_s13 = smov 128   ;;  %s1302_s14 = smov 8  }
  0x13   :  { %38 = dma.hbm_to_vmem [thread:$0]  %s1614_s1, 2048, %s33_s25, [#allocation8], %s1301_s13, %s1301_s13, %s1302_s14  }
  0x14   :  { %s1227_s19 = scalar_lea.hbm %s1613_s0, 1024 }
  0x15   :  { %p1228_p8 = scmp.ne.s32.totalorder %s1613_s0, %s1227_s19  ;;  %p1231_p9 = scmp.lt.u32.totalorder %s1227_s19, %s1613_s0 }
  0x17   :  { %p1233_p10 = pnand %p1231_p9, %p1228_p8 }
  0x19   :  { %1236 = shalt.err (!%p1233_p10)
}
  0x1a   :  { %s1237_s24 = scalar_lea.vmem %s1354_s27, 1024  ;;  %p1242_p12 = scmp.lt.s32.totalorder %s1354_s27, %s1354_s27 }
  0x1b   :  { %p1238_p11 = scmp.ne.s32.totalorder %s1354_s27, %s1237_s24  ;;  %p1243_p13 = scmp.lt.s32.totalorder %s1237_s24, %s1237_s24 }
  0x1d   :  { %p1244_p0 = por %p1243_p13, %p1242_p12 }
  0x1f   :  { %p1245_p1 = pnand %p1244_p0, %p1238_p11 }
  0x21   :  { %1248 = shalt.err (!%p1245_p1)
}
  0x22   :  { %26 = dma.hbm_to_vmem [thread:$0]  %s1613_s0, 1024, %s1354_s27, [#allocation5], %s1301_s13, %s1301_s13, %s1302_s14  }
  0x23   :  { %s1303_s26 = smov [#allocation9]   ;;  %s1249_s8 = scalar_lea.hbm %s1616_s3, 1024 }
  0x24   :  { %s46_s28 = sshll.u32 %s1303_s26, 4  ;;  %p1250_p2 = scmp.ne.s32.totalorder %s1616_s3, %s1249_s8  ;;  %s47_s28 = int_to_ptr.vmem [resolvable:$true] %s46_s28 }
  0x25   :  { %p1253_p3 = scmp.lt.u32.totalorder %s1249_s8, %s1616_s3 }
  0x27   :  { %p1255_p4 = pnand %p1253_p3, %p1250_p2 }
  0x29   :  { %1258 = shalt.err (!%p1255_p4)
}
  0x2a   :  { %s1259_s15 = scalar_lea.vmem %s47_s28, 1024  ;;  %p1264_p6 = scmp.lt.s32.totalorder %s47_s28, %s47_s28 }
  0x2b   :  { %p1260_p5 = scmp.ne.s32.totalorder %s47_s28, %s1259_s15  ;;  %p1265_p7 = scmp.lt.s32.totalorder %s1259_s15, %s1259_s15 }
  0x2d   :  { %p1266_p8 = por %p1265_p7, %p1264_p6 }
  0x2f   :  { %p1267_p9 = pnand %p1266_p8, %p1260_p5 }
  0x31   :  { %1270 = shalt.err (!%p1267_p9)
}
  0x32   :  { %s1304_s0 = smov 512   ;;  %s1305_s27 = smov 32  }
  0x33   :  { %52 = dma.hbm_to_vmem [thread:$0]  %s1616_s3, 1024, %s47_s28, [#allocation8], %s1304_s0, %s1304_s0, %s1305_s27  }
  0x34   :  { %1293 = dma.done.wait [#allocation5], 1024  }
  0x35   :  { %1294 = vsyncadd [#allocation5], 4294966272 }
  0x36   :  { %1295 = dma.done.wait [#allocation8], 3072  }
  0x37   :  { %1296 = vsyncadd [#allocation8], 4294964224  ;;  %v76_v0 = vld [vmem:[#allocation7] sm:$0xff]  ;;  %v77_v1 = vld [vmem:[#allocation7 + $0x8] sm:$0xff]  ;;  %s1306_s19 = smov 64   ;;  %v1308_v53 = vmov 0.0|0.0  }
  0x38   :  { %v78_v2 = vld [vmem:[#allocation7 + $0x10] sm:$0xff]  ;;  %v937_v3 = vpack.c.bf16 %v77_v1, %v76_v0  ;;  %v79_v4 = vld [vmem:[#allocation7 + $0x18] sm:$0xff]  ;;  %v80_v6 = vld [vmem:[#allocation7 + $0x20] sm:$0xff]  ;;  %1001 = vmatprep.subr.bf16.mxu0 %v1308_v53  ;;  %vm225_vm0 = vcmask 523264   ;;  %s1309_s20 = smov 126   ;;  %s1310_s21 = smov 127  }
  0x39   :  { %v941_v5 = vpack.c.bf16 %v79_v4, %v78_v2  ;;  %v81_v7 = vld [vmem:[#allocation7 + $0x28] sm:$0xff]  ;;  %v68_v9 = vld [vmem:[#allocation4] sm:$0xff]  ;;  %v82_v10 = vld [vmem:[#allocation7 + $0x30] sm:$0xff]  ;;  %vm584_vm1 = vcmask 392192  }
  0x3a   :  { %938 = vmatprep.subr.bf16.mxu1 %v937_v3  ;;  %v945_v8 = vpack.c.bf16 %v81_v7, %v80_v6  ;;  %v83_v11 = vld [vmem:[#allocation7 + $0x38] sm:$0xff]  ;;  %925 = vmatprep.mubr.f32.mxu1 %v68_v9  ;;  %v84_v13 = vld [vmem:[#allocation7 + $0x40] sm:$0xff]  ;;  %v85_v14 = vld [vmem:[#allocation7 + $0x48] sm:$0xff] }
  0x3b   :  { %940 = vmatpush3.bf16.msra.mxu1 %v937_v3  ;;  %v949_v12 = vpack.c.bf16 %v83_v11, %v82_v10  ;;  %v953_v15 = vpack.c.bf16 %v85_v14, %v84_v13  ;;  %v86_v16 = vld [vmem:[#allocation7 + $0x50] sm:$0xff]  ;;  %v87_v17 = vld [vmem:[#allocation7 + $0x58] sm:$0xff]  ;;  %v88_v19 = vld [vmem:[#allocation7 + $0x60] sm:$0xff] }
  0x3c   :  { %942 = vmatprep.subr.bf16.mxu1 %v941_v5  ;;  %v957_v18 = vpack.c.bf16 %v87_v17, %v86_v16  ;;  %v89_v20 = vld [vmem:[#allocation7 + $0x68] sm:$0xff]  ;;  %v90_v22 = vld [vmem:[#allocation7 + $0x70] sm:$0xff]  ;;  %v91_v23 = vld [vmem:[#allocation7 + $0x78] sm:$0xff] }
  0x3d   :  { %v961_v21 = vpack.c.bf16 %v89_v20, %v88_v19  ;;  %v965_v24 = vpack.c.bf16 %v91_v23, %v90_v22  ;;  %v69_v25 = vld [vmem:[#allocation4 + $0x8] sm:$0xff]  ;;  %v70_v26 = vld [vmem:[#allocation4 + $0x10] sm:$0xff]  ;;  %v71_v27 = vld [vmem:[#allocation4 + $0x18] sm:$0xff] }
  0x3e   :  { %v72_v28 = vld [vmem:[#allocation4 + $0x20] sm:$0xff]  ;;  %v73_v29 = vld [vmem:[#allocation4 + $0x28] sm:$0xff]  ;;  %v74_v30 = vld [vmem:[#allocation4 + $0x30] sm:$0xff] }
  0x3f   :  { %944 = vmatpush3.bf16.msra.mxu1 %v941_v5  ;;  %v75_v31 = vld [vmem:[#allocation4 + $0x38] sm:$0xff]  ;;  %v827_v34 = vld [vmem:[%s1615_s2] ss:$0 sm:$0xff]  ;;  %s1307_s2 = smov 96  }
  0x40   :  { %946 = vmatprep.subr.bf16.mxu1 %v945_v8 }
  0x43   :  { %948 = vmatpush3.bf16.msra.mxu1 %v945_v8 }
  0x44   :  { %950 = vmatprep.subr.bf16.mxu1 %v949_v12 }
  0x47   :  { %952 = vmatpush3.bf16.msra.mxu1 %v949_v12 }
  0x48   :  { %954 = vmatprep.subr.bf16.mxu1 %v953_v15 }
  0x4b   :  { %956 = vmatpush3.bf16.msra.mxu1 %v953_v15 }
  0x4c   :  { %958 = vmatprep.subr.bf16.mxu1 %v957_v18 }
  0x4f   :  { %960 = vmatpush3.bf16.msra.mxu1 %v957_v18 }
  0x50   :  { %962 = vmatprep.subr.bf16.mxu1 %v961_v21 }
  0x53   :  { %964 = vmatpush3.bf16.msra.mxu1 %v961_v21 }
  0x54   :  { %966 = vmatprep.subr.bf16.mxu1 %v965_v24 }
  0x57   :  { %968 = vmatpush3.bf16.msra.mxu1 %v965_v24 }
  0x5a   :  { %926 = vmatmul.mubr.f32.vlgmr.msra.gmra.mrb[0].mxu1 %v69_v25 }
  0x5b   :  { %928 = vmatprep.mubr.f32.mxu1 %v70_v26 }
  0x5e   :  { %929 = vmatmul.mubr.f32.gmra.mrb[2].mxu1 %v71_v27 }
  0x5f   :  { %931 = vmatprep.mubr.f32.mxu1 %v72_v28 }
  0x62   :  { %932 = vmatmul.mubr.f32.gmra.mrb[4].mxu1 %v73_v29 }
  0x63   :  { %934 = vmatprep.mubr.f32.mxu1 %v74_v30 }
  0x66   :  { %935 = vmatmul.mubr.f32.gmra.mrb[6].mxu1 %v75_v31 }
 0x12d   :  { %v927_v32 = vpop.f32.mrb[0].mxu1 }
 0x12e   :  { %v165_v33 = vpop.f32.mrb[1].mxu1  ;;  %v171_v39 = vadd.f32 %v927_v32, %v827_v34 }
 0x12f   :  { %v166_v40 = vadd.f32 %v827_v34, %v165_v33 }
 0x131   :  { %v930_v35 = vpop.f32.mrb[2].mxu1  ;;  %v1054_v47 = vpack.i.bf16 %v171_v39, %v166_v40 }
 0x132   :  { %v1407_v36 = vadd.f32 %v930_v35, %v827_v34  ;;  %v175_v37 = vpop.f32.mrb[3].mxu1 }
 0x133   :  { %v1409_v38 = vadd.f32 %v827_v34, %v175_v37 }
 0x135   :  { %v933_v41 = vpop.f32.mrb[4].mxu1  ;;  %v1059_v42 = vpack.i.bf16 %v1407_v36, %v1409_v38 }
 0x136   :  { %v185_v43 = vpop.f32.mrb[5].mxu1  ;;  %v191_v44 = vadd.f32 %v933_v41, %v827_v34 }
 0x137   :  { %1060 = vrot.lane.b32.xlu1 %v1059_v42, %s1306_s19  ;;  %1050 = vrot.lane.b32.xlu0 %v1059_v42, %s1306_s19  ;;  %v186_v45 = vadd.f32 %v827_v34, %v185_v43 }
 0x139   :  { %v936_v46 = vpop.f32.mrb[6].mxu1  ;;  %v1069_v52 = vpack.i.bf16 %v191_v44, %v186_v45 }
 0x13a   :  { %v1413_v48 = vadd.f32 %v936_v46, %v827_v34  ;;  %v195_v49 = vpop.f32.mrb[7].mxu1 }
 0x13b   :  { %v1415_v50 = vadd.f32 %v827_v34, %v195_v49  ;;  %1055 = vrot.lane.b32.xlu0 %v1054_v47, %s1306_s19 }
 0x13d   :  { %v1064_v51 = vpack.i.bf16 %v1413_v48, %v1415_v50 }
 0x13f   :  { %1065 = vrot.lane.b32.xlu1 %v1064_v51, %s1306_s19  ;;  %1070 = vrot.lane.b32.xlu0 %v1069_v52, %s1306_s19 }
 0x143   :  { %1075 = vrot.lane.b32.xlu1 %v1054_v47, %s1307_s2  ;;  %1080 = vrot.lane.b32.xlu0 %v1059_v42, %s1305_s27 }
 0x147   :  { %1085 = vrot.lane.b32.xlu1 %v1069_v52, %s1307_s2  ;;  %1095 = vrot.lane.b32.xlu0 %v1064_v51, %s1305_s27 }
 0x14b   :  { %1090 = vrot.lane.b32.xlu1 %v1059_v42, %s1307_s2  ;;  %1100 = vrot.lane.b32.xlu0 %v1069_v52, %s1305_s27 }
 0x14f   :  { %1105 = vrot.lane.b32.xlu1 %v1069_v52, %s1306_s19 }
 0x1a9   :  { %v1061_v54 = vpop.permute.xlu1 %1060  ;;  %v1051_v55 = vpop.permute.xlu0 %1050 }
 0x1aa   :  { %v1063_v56 = vunpack.i.h.bf16 %v1061_v54  ;;  %v1062_v57 = vunpack.i.l.bf16 %v1061_v54  ;;  %v1053_v58 = vunpack.i.h.bf16 %v1051_v55  ;;  %v1052_v59 = vunpack.i.l.bf16 %v1051_v55 }
 0x1ac   :  { %v1424_v60 = vsel %vm225_vm0, %v1052_v59, %v186_v45  ;;  %v1427_v61 = vsel %vm225_vm0, %v1053_v58, %v191_v44  ;;  %v1430_v62 = vsel %vm225_vm0, %v166_v40, %v1062_v57  ;;  %v1433_v63 = vsel %vm225_vm0, %v171_v39, %v1063_v56 }
 0x1ad   :  { %v1056_v0 = vpop.permute.xlu0 %1055  ;;  %v1119_v1 = vpack.i.bf16 %v1427_v61, %v1424_v60  ;;  %v971_v4 = vpack.c.bf16 %v1433_v63, %v1430_v62  ;;  %v997_v5 = vpack.c.bf16 %v1427_v61, %v1424_v60  ;;  %v1124_v11 = vpack.i.bf16 %v1433_v63, %v1430_v62  ;;  %v514_v60 = vld [vmem:[#allocation9 + $0x20] sm:$0xff] }
 0x1ae   :  { %v1058_v2 = vunpack.i.h.bf16 %v1056_v0  ;;  %v1057_v3 = vunpack.i.l.bf16 %v1056_v0 }
 0x1af   :  { %1120 = vrot.lane.b32.xlu1 %v1119_v1, %s1309_s20  ;;  %1110 = vrot.lane.b32.xlu0 %v1119_v1, %s1310_s21 }
 0x1b0   :  { %v1445_v6 = vsel %vm225_vm0, %v1057_v3, %v1409_v38  ;;  %v1449_v7 = vsel %vm225_vm0, %v1058_v2, %v1407_v36 }
 0x1b1   :  { %v1066_v8 = vpop.permute.xlu1 %1065  ;;  %v1071_v9 = vpop.permute.xlu0 %1070  ;;  %v1453_v10 = vpack.i.bf16 %v1449_v7, %v1445_v6  ;;  %v995_v12 = vpack.c.bf16 %v1449_v7, %v1445_v6 }
 0x1b2   :  { %v1068_v13 = vunpack.i.h.bf16 %v1066_v8  ;;  %v1067_v14 = vunpack.i.l.bf16 %v1066_v8  ;;  %v1073_v15 = vunpack.i.h.bf16 %v1071_v9  ;;  %v1072_v16 = vunpack.i.l.bf16 %v1071_v9  ;;  %v511_v8 = vld [vmem:[#allocation9 + $0x8] sm:$0xff]  ;;  %v513_v9 = vld [vmem:[#allocation9 + $0x18] sm:$0xff] }
 0x1b3   :  { %1115 = vrot.lane.b32.xlu0 %v1453_v10, %s1309_s20  ;;  %1125 = vrot.lane.b32.xlu1 %v1124_v11, %s1310_s21 }
 0x1b4   :  { %v1463_v17 = vsel %vm225_vm0, %v186_v45, %v1067_v14  ;;  %v1466_v18 = vsel %vm225_vm0, %v191_v44, %v1068_v13  ;;  %v1470_v19 = vsel %vm225_vm0, %v1409_v38, %v1072_v16  ;;  %v1474_v20 = vsel %vm225_vm0, %v1407_v36, %v1073_v15  ;;  %655 = vmatprep.mubr.f32.mxu1 %v511_v8 }
 0x1b5   :  { %v1076_v21 = vpop.permute.xlu1 %1075  ;;  %v1081_v22 = vpop.permute.xlu0 %1080  ;;  %v1134_v23 = vpack.i.bf16 %v1466_v18, %v1463_v17  ;;  %v1129_v24 = vpack.i.bf16 %v1474_v20, %v1470_v19  ;;  %v973_v29 = vpack.c.bf16 %v1474_v20, %v1470_v19  ;;  %v1008_v30 = vpack.c.bf16 %v1466_v18, %v1463_v17  ;;  %828 = vmatprep.mubr.msk.f32.mxu0 %vm584_vm1, %v513_v9 }
 0x1b6   :  { %v1078_v25 = vunpack.i.h.bf16 %v1076_v21  ;;  %v1077_v26 = vunpack.i.l.bf16 %v1076_v21  ;;  %v1083_v27 = vunpack.i.h.bf16 %v1081_v22  ;;  %v1082_v28 = vunpack.i.l.bf16 %v1081_v22 }
 0x1b7   :  { %1135 = vrot.lane.b32.xlu0 %v1134_v23, %s1310_s21  ;;  %1130 = vrot.lane.b32.xlu1 %v1129_v24, %s1310_s21 }
 0x1b8   :  { %v1487_v31 = vsel %vm225_vm0, %v1077_v26, %v1082_v28  ;;  %v1490_v32 = vsel %vm225_vm0, %v1078_v25, %v1083_v27 }
 0x1b9   :  { %v1086_v33 = vpop.permute.xlu1 %1085  ;;  %v1096_v34 = vpop.permute.xlu0 %1095  ;;  %v983_v35 = vpack.c.bf16 %v1490_v32, %v1487_v31  ;;  %v1154_v44 = vpack.i.bf16 %v1490_v32, %v1487_v31 }
 0x1ba   :  { %v1088_v36 = vunpack.i.h.bf16 %v1086_v33  ;;  %v1087_v37 = vunpack.i.l.bf16 %v1086_v33  ;;  %v1098_v38 = vunpack.i.h.bf16 %v1096_v34  ;;  %v1097_v39 = vunpack.i.l.bf16 %v1096_v34 }
 0x1bb   :  { %1140 = vrot.lane.b32.xlu0 %v1124_v11, %s1309_s20  ;;  %1150 = vrot.lane.b32.xlu1 %v1134_v23, %s1309_s20  ;;  %v573_v11 = vld [vmem:[%s1617_s4 + $0x8] sm:$0xff] }
 0x1bc   :  { %v1497_v40 = vsel %vm225_vm0, %v1087_v37, %v1097_v39  ;;  %v1500_v41 = vsel %vm225_vm0, %v1088_v36, %v1098_v38 }
 0x1bd   :  { %v1091_v42 = vpop.permute.xlu1 %1090  ;;  %v1101_v43 = vpop.permute.xlu0 %1100  ;;  %v1017_v45 = vpack.c.bf16 %v1500_v41, %v1497_v40  ;;  %v1164_v56 = vpack.i.bf16 %v1500_v41, %v1497_v40 }
 0x1be   :  { %v1093_v46 = vunpack.i.h.bf16 %v1091_v42  ;;  %v1092_v47 = vunpack.i.l.bf16 %v1091_v42  ;;  %v1103_v49 = vunpack.i.h.bf16 %v1101_v43  ;;  %v1102_v51 = vunpack.i.l.bf16 %v1101_v43 }
 0x1bf   :  { %1145 = vrot.lane.b32.xlu0 %v1129_v24, %s1309_s20  ;;  %1155 = vrot.lane.b32.xlu1 %v1154_v44, %s1310_s21 }
 0x1c0   :  { %v1509_v52 = vsel %vm225_vm0, %v1092_v47, %v1102_v51  ;;  %v1512_v54 = vsel %vm225_vm0, %v1093_v46, %v1103_v49 }
 0x1c1   :  { %v1106_v55 = vpop.permute.xlu1 %1105  ;;  %v1159_v57 = vpack.i.bf16 %v1512_v54, %v1509_v52  ;;  %v985_v58 = vpack.c.bf16 %v1512_v54, %v1509_v52 }
 0x1c2   :  { %v1108_v59 = vunpack.i.h.bf16 %v1106_v55  ;;  %v1107_v0 = vunpack.i.l.bf16 %v1106_v55 }
 0x1c3   :  { %1165 = vrot.lane.b32.xlu0 %v1164_v56, %s1310_s21  ;;  %1160 = vrot.lane.b32.xlu1 %v1159_v57, %s1310_s21 }
 0x1c4   :  { %v1524_v1 = vsel %vm225_vm0, %v1107_v0, %v1415_v50  ;;  %v1528_v2 = vsel %vm225_vm0, %v1108_v59, %v1413_v48  ;;  %v572_v48 = vld [vmem:[%s1617_s4] sm:$0xff] }
 0x1c5   :  { %v1026_v3 = vpack.c.bf16 %v1528_v2, %v1524_v1  ;;  %v1189_v50 = vpack.i.bf16 %v1528_v2, %v1524_v1  ;;  %v517_v1 = vld [vmem:[#allocation9 + $0x38] sm:$0xff]  ;;  %v516_v2 = vld [vmem:[#allocation9 + $0x30] sm:$0xff] }
 0x1c7   :  { %1170 = vrot.lane.b32.xlu0 %v1154_v44, %s1309_s20  ;;  %1175 = vrot.lane.b32.xlu1 %v1164_v56, %s1309_s20 }
 0x1cb   :  { %1180 = vrot.lane.b32.xlu0 %v1159_v57, %s1309_s20  ;;  %1185 = vrot.lane.b32.xlu1 %v1453_v10, %s1310_s21  ;;  %v1311_v10 = vmov 0  }
 0x1cc   :  { %1199 = vset.pattern.permute.xlu0 %v1311_v10  ;;  %1200 = vset.pattern.permute.xlu1 %v1311_v10 }
 0x1cf   :  { %1190 = vrot.lane.b32.xlu0 %v1189_v50, %s1310_s21  ;;  %1195 = vrot.lane.b32.xlu1 %v1189_v50, %s1309_s20 }
 0x1d3   :  { %576 = vperm.xlu0 %1199, %v572_v48   ;;  %581 = vperm.xlu1 %1200, %v573_v11  }
 0x221   :  { %v1121_v13 = vpop.permute.xlu1 %1120  ;;  %v1111_v14 = vpop.permute.xlu0 %1110 }
 0x222   :  { %v1113_v15 = vunpack.i.h.bf16 %v1111_v14  ;;  %v1112_v16 = vunpack.i.l.bf16 %v1111_v14  ;;  %v1123_v21 = vunpack.i.h.bf16 %v1121_v13  ;;  %v1122_v22 = vunpack.i.l.bf16 %v1121_v13 }
 0x224   :  { %v1002_v23 = vpack.c.bf16 %v1113_v15, %v1112_v16  ;;  %v1005_v28 = vpack.c.bf16 %v1123_v21, %v1122_v22 }
 0x225   :  { %v1116_v24 = vpop.permute.xlu0 %1115  ;;  %v1126_v25 = vpop.permute.xlu1 %1125 }
 0x226   :  { %v1118_v26 = vunpack.i.h.bf16 %v1116_v24  ;;  %v1117_v27 = vunpack.i.l.bf16 %v1116_v24  ;;  %1003 = vmatpush1.bf16.msra.mxu0 %v1002_v23  ;;  %v1128_v34 = vunpack.i.h.bf16 %v1126_v25  ;;  %v1127_v36 = vunpack.i.l.bf16 %v1126_v25 }
 0x227   :  { %1004 = vmatprep.subr.bf16.mxu0 %v1308_v53 }
 0x228   :  { %v969_v33 = vpack.c.bf16 %v1118_v26, %v1117_v27  ;;  %v975_v46 = vpack.c.bf16 %v1128_v34, %v1127_v36  ;;  %v510_v36 = vld [vmem:[#allocation9] sm:$0xff] }
 0x229   :  { %v1136_v37 = vpop.permute.xlu0 %1135  ;;  %v1131_v38 = vpop.permute.xlu1 %1130 }
 0x22a   :  { %v1133_v39 = vunpack.i.h.bf16 %v1131_v38  ;;  %v1132_v42 = vunpack.i.l.bf16 %v1131_v38  ;;  %970 = vmatprep.subr.bf16.mxu1 %v969_v33  ;;  %1006 = vmatpush1.bf16.msra.mxu0 %v1005_v28  ;;  %v1138_v43 = vunpack.i.h.bf16 %v1136_v37  ;;  %v1137_v44 = vunpack.i.l.bf16 %v1136_v37  ;;  %v515_v37 = vld [vmem:[#allocation9 + $0x28] sm:$0xff] }
 0x22b   :  { %972 = vmatpush3.bf16.msra.mxu1 %v971_v4  ;;  %1007 = vmatprep.subr.bf16.mxu0 %v1308_v53 }
 0x22c   :  { %974 = vmatprep.subr.bf16.mxu1 %v973_v29  ;;  %v977_v51 = vpack.c.bf16 %v1133_v39, %v1132_v42  ;;  %v1011_v62 = vpack.c.bf16 %v1138_v43, %v1137_v44 }
 0x22d   :  { %v1141_v47 = vpop.permute.xlu0 %1140  ;;  %v1151_v49 = vpop.permute.xlu1 %1150 }
 0x22e   :  { %v1143_v55 = vunpack.i.h.bf16 %v1141_v47  ;;  %v1142_v56 = vunpack.i.l.bf16 %v1141_v47  ;;  %1009 = vmatpush1.bf16.msra.mxu0 %v1008_v30  ;;  %v1153_v4 = vunpack.i.h.bf16 %v1151_v49  ;;  %v1152_v57 = vunpack.i.l.bf16 %v1151_v49 }
 0x22f   :  { %976 = vmatpush3.bf16.msra.mxu1 %v975_v46  ;;  %1010 = vmatprep.subr.bf16.mxu0 %v1308_v53 }
 0x230   :  { %v979_v63 = vpack.c.bf16 %v1143_v55, %v1142_v56  ;;  %978 = vmatprep.subr.bf16.mxu1 %v977_v51  ;;  %v1014_v0 = vpack.c.bf16 %v1153_v4, %v1152_v57 }
 0x231   :  { %v1146_v19 = vpop.permute.xlu0 %1145  ;;  %v1156_v20 = vpop.permute.xlu1 %1155 }
 0x232   :  { %v1148_v29 = vunpack.i.h.bf16 %v1146_v19  ;;  %v1147_v59 = vunpack.i.l.bf16 %v1146_v19  ;;  %1012 = vmatpush1.bf16.msra.mxu0 %v1011_v62  ;;  %v1158_v17 = vunpack.i.h.bf16 %v1156_v20  ;;  %v1157_v18 = vunpack.i.l.bf16 %v1156_v20 }
 0x233   :  { %980 = vmatpush3.bf16.msra.mxu1 %v979_v63  ;;  %1013 = vmatprep.subr.bf16.mxu0 %v1308_v53  ;;  %v1312_v62 = vmov 0.0  }
 0x234   :  { %v981_v8 = vpack.c.bf16 %v1148_v29, %v1147_v59  ;;  %v987_v13 = vpack.c.bf16 %v1158_v17, %v1157_v18 }
 0x235   :  { %v1166_v30 = vpop.permute.xlu0 %1165  ;;  %v1161_v50 = vpop.permute.xlu1 %1160 }
 0x236   :  { %v1163_v9 = vunpack.i.h.bf16 %v1161_v50  ;;  %v1162_v48 = vunpack.i.l.bf16 %v1161_v50  ;;  %982 = vmatprep.subr.bf16.mxu1 %v981_v8  ;;  %1015 = vmatpush1.bf16.msra.mxu0 %v1014_v0  ;;  %v1168_v11 = vunpack.i.h.bf16 %v1166_v30  ;;  %v1167_v10 = vunpack.i.l.bf16 %v1166_v30 }
 0x237   :  { %984 = vmatpush3.bf16.msra.mxu1 %v983_v35  ;;  %1016 = vmatprep.subr.bf16.mxu0 %v1308_v53 }
 0x238   :  { %986 = vmatprep.subr.bf16.mxu1 %v985_v58  ;;  %v989_v16 = vpack.c.bf16 %v1163_v9, %v1162_v48  ;;  %v1020_v31 = vpack.c.bf16 %v1168_v11, %v1167_v10 }
 0x239   :  { %v1171_v14 = vpop.permute.xlu0 %1170  ;;  %v1176_v15 = vpop.permute.xlu1 %1175 }
 0x23a   :  { %v1173_v21 = vunpack.i.h.bf16 %v1171_v14  ;;  %v1172_v22 = vunpack.i.l.bf16 %v1171_v14  ;;  %1018 = vmatpush1.bf16.msra.mxu0 %v1017_v45  ;;  %v1178_v35 = vunpack.i.h.bf16 %v1176_v15  ;;  %v1177_v23 = vunpack.i.l.bf16 %v1176_v15 }
 0x23b   :  { %988 = vmatpush3.bf16.msra.mxu1 %v987_v13  ;;  %1019 = vmatprep.subr.bf16.mxu0 %v1308_v53 }
 0x23c   :  { %v991_v32 = vpack.c.bf16 %v1173_v21, %v1172_v22  ;;  %990 = vmatprep.subr.bf16.mxu1 %v989_v16  ;;  %v1023_v25 = vpack.c.bf16 %v1178_v35, %v1177_v23 }
 0x23d   :  { %v1181_v52 = vpop.permute.xlu0 %1180  ;;  %v1186_v24 = vpop.permute.xlu1 %1185 }
 0x23e   :  { %v1183_v54 = vunpack.i.h.bf16 %v1181_v52  ;;  %v1182_v58 = vunpack.i.l.bf16 %v1181_v52  ;;  %1021 = vmatpush1.bf16.msra.mxu0 %v1020_v31  ;;  %v1188_v40 = vunpack.i.h.bf16 %v1186_v24  ;;  %v1187_v41 = vunpack.i.l.bf16 %v1186_v24  ;;  %v770_v52 = vld [vmem:[%s1618_s5 + $0x8] sm:$0xff] }
 0x23f   :  { %992 = vmatpush3.bf16.msra.mxu1 %v991_v32  ;;  %1022 = vmatprep.subr.bf16.mxu0 %v1308_v53 }
 0x240   :  { %v993_v26 = vpack.c.bf16 %v1183_v54, %v1182_v58  ;;  %v999_v33 = vpack.c.bf16 %v1188_v40, %v1187_v41  ;;  %v769_v58 = vld [vmem:[%s1618_s5] sm:$0xff]  ;;  %v778_v41 = vld [vmem:[%s1619_s6 + $0x8] sm:$0xff]  ;;  %s1313_s5 = smov [#allocation10]  }
 0x241   :  { %v1191_v45 = vpop.permute.xlu0 %1190  ;;  %v1196_v34 = vpop.permute.xlu1 %1195  ;;  %s814_s10 = sshll.u32 %s1313_s5, 4  ;;  %s815_s10 = int_to_ptr.vmem [resolvable:$true] %s814_s10 }
 0x242   :  { %994 = vmatprep.subr.bf16.mxu1 %v993_v26  ;;  %1024 = vmatpush1.bf16.msra.mxu0 %v1023_v25  ;;  %v1193_v27 = vunpack.i.h.bf16 %v1191_v45  ;;  %v1192_v28 = vunpack.i.l.bf16 %v1191_v45  ;;  %v1198_v7 = vunpack.i.h.bf16 %v1196_v34  ;;  %v777_v45 = vld [vmem:[%s1619_s6] sm:$0xff]  ;;  %s1271_s6 = scalar_lea.vmem %s815_s10, 256  ;;  %p1276_p11 = scmp.lt.s32.totalorder %s815_s10, %s815_s10 }
 0x243   :  { %996 = vmatpush3.bf16.msra.mxu1 %v995_v12  ;;  %1025 = vmatprep.subr.bf16.mxu0 %v1308_v53  ;;  %v1197_v12 = vunpack.i.l.bf16 %v1196_v34  ;;  %p1272_p10 = scmp.ne.s32.totalorder %s815_s10, %s1271_s6  ;;  %p1277_p12 = scmp.lt.s32.totalorder %s1271_s6, %s1271_s6 }
 0x244   :  { %998 = vmatprep.subr.bf16.mxu1 %v997_v5  ;;  %v1029_v6 = vpack.c.bf16 %v1193_v27, %v1192_v28  ;;  %v512_v5 = vld [vmem:[#allocation9 + $0x10] sm:$0xff] }
 0x245   :  { %v1032_v61 = vpack.c.bf16 %v1198_v7, %v1197_v12  ;;  %p1278_p13 = por %p1277_p12, %p1276_p11 }
 0x246   :  { %1027 = vmatpush1.bf16.msra.mxu0 %v1026_v3  ;;  %v741_v3 = vlaneseq }
 0x247   :  { %1000 = vmatpush3.bf16.msra.mxu1 %v999_v33  ;;  %1028 = vmatprep.subr.bf16.mxu0 %v1308_v53  ;;  %p1279_p0 = pnand %p1278_p13, %p1272_p10 }
 0x248   :  { %v742_v38 = vand.u32 127, %v741_v3 }
 0x24a   :  { %1030 = vmatpush1.bf16.msra.mxu0 %v1029_v6  ;;  %656 = vmatmul.mubr.f32.vlgmr.msra.gmra.mrb[8].mxu1 %v510_v36  ;;  %v743_v42 = vand.u32 15, %v742_v38 }
 0x24b   :  { %1031 = vmatprep.subr.bf16.mxu0 %v1308_v53  ;;  %660 = vmatprep.mubr.f32.mxu1 %v515_v37 }
 0x24c   :  { %vm744_vm2 = vcmp.lt.s32.totalorder %v743_v42, 14 }
 0x24d   :  { %v830_v63 = vsel %vm744_vm2, 1.0, %v1312_v62 }
 0x24e   :  { %1033 = vmatpush1.bf16.msra.mxu0 %v1032_v61  ;;  %661 = vmatmul.mubr.f32.gmra.mrb[10].mxu1 %v514_v60 }
 0x251   :  { %731 = vmatmul.mubr.f32.vlgmr.msra.gmra.mrb[0].mxu0 %v512_v5 }
 0x252   :  { %829 = vmatprep.mubr.msk.f32.mxu0 %vm584_vm1, %v517_v1  ;;  %v577_v44 = vpop.permute.xlu0 %576  ;;  %v582_v51 = vpop.permute.xlu1 %581 }
 0x255   :  { %736 = vmatmul.mubr.f32.gmra.mrb[2].mxu0 %v516_v2 }
 0x31d   :  { %v887_v39 = vpop.f32.mrb[8].mxu1 }
 0x31e   :  { %v888_v43 = vpop.f32.mrb[9].mxu1 }
 0x31f   :  { %v889_v46 = vadd.f32 %v888_v43, %v887_v39 }
 0x321   :  { %v658_v53 = vadd.f32 %v889_v46, %v577_v44  ;;  %v890_v47 = vpop.f32.mrb[10].mxu1 }
 0x322   :  { %v891_v49 = vpop.f32.mrb[11].mxu1 }
 0x323   :  { %v892_v55 = vadd.f32 %v891_v49, %v890_v47 }
 0x324   :  { %v732_v56 = vpop.f32.mrb[0].mxu0 }
 0x325   :  { %v733_v4 = vadd.f32 %v732_v56, %v658_v53  ;;  %v663_v57 = vadd.f32 %v892_v55, %v582_v51  ;;  %v734_v19 = vpop.f32.mrb[1].mxu0 }
 0x327   :  { %v747_v20 = vmul.f32 %v830_v63, %v733_v4 }
 0x328   :  { %v737_v29 = vpop.f32.mrb[2].mxu0 }
 0x329   :  { %v738_v59 = vadd.f32 %v737_v29, %v663_v57  ;;  %v739_v0 = vpop.f32.mrb[3].mxu0  ;;  %749 = vadd.xlane.f32.xlu1 %v747_v20  ;;  %v753_v18 = vmul.f32 %v747_v20, %v747_v20 }
 0x32b   :  { %v748_v8 = vmul.f32 %v830_v63, %v738_v59 }
 0x32d   :  { %751 = vadd.xlane.f32.xlu0 %v748_v8  ;;  %v754_v17 = vmul.f32 %v748_v8, %v748_v8 }
 0x32f   :  { %757 = vadd.xlane.f32.xlu1 %v754_v17 }
 0x331   :  { %755 = vadd.xlane.f32.xlu0 %v753_v18 }
 0x3b6   :  { %v750_v30 = vpop.xlane.xlu1 %749 }
 0x3b7   :  { %v759_v9 = vmul.f32 0.008928572, %v750_v30 }
 0x3b9   :  { %v763_v15 = vmul.f32 %v759_v9, %v759_v9 }
 0x3ba   :  { %v752_v50 = vpop.xlane.xlu0 %751 }
 0x3bb   :  { %v760_v48 = vmul.f32 0.008928572, %v752_v50 }
 0x3bc   :  { %v758_v11 = vpop.xlane.xlu1 %757 }
 0x3bd   :  { %v764_v10 = vmul.f32 %v760_v48, %v760_v48  ;;  %v762_v13 = vmul.f32 0.008928572, %v758_v11 }
 0x3be   :  { %v756_v14 = vpop.xlane.xlu0 %755 }
 0x3bf   :  { %v766_v16 = vsub.f32 %v762_v13, %v764_v10  ;;  %v761_v21 = vmul.f32 0.008928572, %v756_v14 }
 0x3c1   :  { %v768_v22 = vmax.f32 %v766_v16, 0.0  ;;  %v765_v31 = vsub.f32 %v761_v21, %v763_v15 }
 0x3c3   :  { %v772_v32 = vadd.f32 1e-05, %v768_v22  ;;  %v767_v35 = vmax.f32 %v765_v31, 0.0 }
 0x3c5   :  { %1201 = vrsqrt.f32 %v772_v32  ;;  %v771_v23 = vadd.f32 1e-05, %v767_v35 }
 0x3c7   :  { %1203 = vrsqrt.f32 %v771_v23 }
 0x3cf   :  { %v1202_v54 = vpop.eup %1201 }
 0x3d0   :  { %v776_v24 = vmul.f32 %v1202_v54, %v770_v52 }
 0x3d1   :  { %v1204_v25 = vpop.eup %1203 }
 0x3d2   :  { %790 = vperm.xlu1 %1200, %v776_v24   ;;  %v775_v26 = vmul.f32 %v1204_v25, %v769_v58  ;;  %v780_v40 = vmul.f32 %v776_v24, %v760_v48 }
 0x3d4   :  { %785 = vperm.xlu0 %1199, %v775_v26   ;;  %v779_v27 = vmul.f32 %v775_v26, %v759_v9  ;;  %v782_v28 = vsub.f32 %v778_v41, %v780_v40 }
 0x3d6   :  { %v781_v33 = vsub.f32 %v777_v45, %v779_v27 }
 0x3d8   :  { %802 = vperm.xlu0 %1199, %v782_v28   ;;  %797 = vperm.xlu1 %1200, %v781_v33  }
 0x451   :  { %v791_v34 = vpop.permute.xlu1 %790 }
 0x452   :  { %v794_v6 = vmul.f32 %v791_v34, %v738_v59 }
 0x453   :  { %v786_v36 = vpop.permute.xlu0 %785 }
 0x454   :  { %v793_v7 = vmul.f32 %v786_v36, %v733_v4 }
 0x457   :  { %v803_v12 = vpop.permute.xlu0 %802  ;;  %v798_v37 = vpop.permute.xlu1 %797 }
 0x458   :  { %v806_v60 = vadd.f32 %v803_v12, %v794_v6  ;;  %v805_v61 = vadd.f32 %v798_v37, %v793_v7 }
 0x45a   :  { %808 = vst [vmem:[#allocation10 + $0x8] sm:$0xff] %v806_v60  ;;  %807 = vst [vmem:[#allocation10] sm:$0xff] %v805_v61 }
 0x45b   :  { %1282 = shalt.err (!%p1279_p0)
}
 0x45c   :  { %s1283_s15 = scalar_lea.hbm %s1620_s7, 256 }
 0x45d   :  { %p1284_p1 = scmp.ne.s32.totalorder %s1620_s7, %s1283_s15  ;;  %p1287_p2 = scmp.lt.u32.totalorder %s1283_s15, %s1620_s7 }
 0x45f   :  { %p1289_p3 = pnand %p1287_p2, %p1284_p1 }
 0x461   :  { %1292 = shalt.err (!%p1289_p3)
}
 0x462   :  { %820 = dma.vmem_to_hbm [thread:$0]  %s815_s10, 256, %s1620_s7, [#allocation6], %s1301_s13, %s1301_s13, %s1302_s14  }
 0x463   :  { %1297 = dma.done.wait [#allocation6], 256  }
 0x464   :  { %1298 = vsyncadd [#allocation6], 4294967040 }
 0x465   :  { %824 = vsyncpa [#allocation5], 1 }
 0x466   :  { %825 = vsyncpa [#allocation8], 1 }
 0x467   :  { %826 = vsyncpa [#allocation6], 1 }

</bundles_post_ra>
